<compile_context>
chip_gen: v7x
topology: tpu7x:2x2x1
jax: 0.10.0
libtpu: 0.0.40
codegen_flags: <defaults>
</compile_context>

<pallas_src>
import jax
import jax.numpy as jnp
from jax.experimental import pallas as pl
from jax.experimental.pallas import tpu as pltpu


def _round_up(x, m):
    return ((x + m - 1) // m) * m


def highway_kernel(x_ref, w_ref, b_ref, o_ref):
    # x_ref: [tile_b, Dp] f32 ; w_ref: [Dp, 2*Dp] bf16 ; b_ref: [1, 2*Dp] f32.
    x = x_ref[...]
    d = x.shape[-1]
    # One fused MXU matmul for both the affine and the gate path (bf16 inputs,
    # f32 accumulation), then one broadcast bias add.
    y = jnp.dot(x.astype(w_ref.dtype), w_ref[...],
                preferred_element_type=jnp.float32) + b_ref[...]
    g = jnp.maximum(y[:, :d], 0.0)       # relu(x @ W_a + b_a)
    t = jax.nn.sigmoid(y[:, d:])         # sigmoid(x @ W_g + b_g)
    # Highway combine: t*g + (1-t)*x == x + t*(g - x)  (one fewer VPU op)
    o_ref[...] = (x + t * (g - x)).astype(o_ref.dtype)


def prepare_highway_params(w_affine, b_affine, w_gate, b_gate,
                           matmul_dtype=jnp.bfloat16):
    """One-time parameter prep -- call once at model load, NOT per forward.

    Fuses the two D->D linears into a single [Dp, 2*Dp] weight and [1, 2*Dp]
    bias (Dp = D rounded up to a multiple of 128 so the kernel output stays
    lane-dense) and casts the weight to the MXU input dtype once.
    Weights are expected in (in, out) layout, i.e. the kernel computes x @ W.
    """
    D = w_affine.shape[0]
    Dp = _round_up(max(D, 128), 128)
    if Dp != D:
        pad2 = ((0, Dp - D), (0, Dp - D))
        w_affine = jnp.pad(w_affine, pad2)
        w_gate = jnp.pad(w_gate, pad2)
        b_affine = jnp.pad(b_affine, (0, Dp - D))
        b_gate = jnp.pad(b_gate, (0, Dp - D))
    w_fused = jnp.concatenate([w_affine, w_gate], axis=1).astype(matmul_dtype)
    b_fused = jnp.concatenate([b_affine, b_gate], axis=0)
    b_fused = b_fused.reshape(1, 2 * Dp).astype(jnp.float32)
    return w_fused, b_fused


def _vmem_budget_bytes():
    # Per-TensorCore VMEM minus headroom for compiler scratch / semaphores:
    # ~56 MiB on v7x (64 MiB/TC), capped at 112 MiB on v5e/v6e (128 MiB).
    try:
        cap = int(pltpu.get_tpu_info().vmem_capacity_bytes)
    except Exception:
        cap = 64 * 1024 * 1024          # conservative fallback (v7x per-TC)
    return min(cap * 7 // 8, 112 * 1024 * 1024)


def _select_tile_b(B, Dp, w_itemsize, vmem_budget):
    b_pad = _round_up(B, 16)            # bf16 packs 16 rows per vreg sublane group
    fixed = Dp * (2 * Dp) * w_itemsize + (2 * Dp) * 4   # single-buffered W + bias
    per_row = (2 + 2) * Dp * 4          # x + out tiles, double-buffered, f32
    avail = vmem_budget - fixed
    if avail >= per_row * 16:
        budget_cap = (avail // per_row) // 16 * 16
    else:
        budget_cap = 16
        # TODO(synk): for Dp large enough that the resident [Dp, 2*Dp] weight
        # alone (nearly) fills VMEM (Dp >= ~2048 on v7x), add an output-column
        # grid axis (two separate (Dp, tn) weight specs) instead of shrinking
        # tile_b further.
    tile_b = min(b_pad, 512, budget_cap)
    if B >= 32:
        # Guarantee >= 2 grid steps so the "parallel" axis shards across both
        # v7x TensorCores (no effect on single-TC v5e/v6e).
        tile_b = min(tile_b, _round_up(pl.cdiv(B, 2), 16))
    return max(tile_b, 16)


def highway_cell(x, w_fused, b_fused):
    """x: [B, D]. w_fused/b_fused produced by prepare_highway_params()."""
    B, D = x.shape
    Dp = w_fused.shape[0]
    if Dp != D:
        x = jnp.pad(x, ((0, 0), (0, Dp - D)))

    w_itemsize = jnp.dtype(w_fused.dtype).itemsize
    vmem_budget = _vmem_budget_bytes()
    tile_b = _select_tile_b(B, Dp, w_itemsize, vmem_budget)
    grid = (pl.cdiv(B, tile_b),)

    # VMEM footprint: x/out double-buffered, weight/bias single-buffered.
    vmem_est = (2 * tile_b * Dp * 4 + 2 * tile_b * Dp * 4
                + Dp * (2 * Dp) * w_itemsize + (2 * Dp) * 4)
    compiler_kwargs = dict(dimension_semantics=("parallel",))
    if vmem_est > 16 * 1024 * 1024:
        compiler_kwargs["vmem_limit_bytes"] = int(
            min(max(vmem_est * 9 // 8, 16 * 1024 * 1024), vmem_budget))

    resident = pl.Buffered(1)   # constant index_map => no next-block prefetch
    out = pl.pallas_call(
        highway_kernel,
        out_shape=jax.ShapeDtypeStruct((B, Dp), x.dtype),
        grid_spec=pltpu.PrefetchScalarGridSpec(
            num_scalar_prefetch=0,
            grid=grid,
            in_specs=[
                pl.BlockSpec((tile_b, Dp), lambda i: (i, 0)),        # x tile
                pl.BlockSpec((Dp, 2 * Dp), lambda i: (0, 0),
                             pipeline_mode=resident),                # fused W (resident)
                pl.BlockSpec((1, 2 * Dp), lambda i: (0, 0),
                             pipeline_mode=resident),                # fused bias
            ],
            out_specs=pl.BlockSpec((tile_b, Dp), lambda i: (i, 0)),
        ),
        compiler_params=pltpu.CompilerParams(**compiler_kwargs),
    )(x, w_fused, b_fused)
    return out[:, :D] if Dp != D else out


if __name__ == "__main__":
    key = jax.random.PRNGKey(0)
    B, D = 8, 128   # batch_size, size

    k_x, k_wa, k_ba, k_wg = jax.random.split(key, 4)
    x = jax.random.normal(k_x, (B, D), dtype=jnp.float32)

    # Deterministic parameter init (shapes match nn.Linear(size, size),
    # stored as [in, out] so the kernel does a plain x @ W).
    bound = 1.0 / jnp.sqrt(D)
    w_affine = jax.random.uniform(k_wa, (D, D), jnp.float32, -bound, bound)
    b_affine = jax.random.uniform(k_ba, (D,), jnp.float32, -bound, bound)
    w_gate = jax.random.uniform(k_wg, (D, D), jnp.float32, -bound, bound)
    b_gate = jnp.full((D,), -2.0, dtype=jnp.float32)   # gate_bias = -2

    # One-time parameter prep (fusion + bf16 cast) -- outside the hot path.
    w_fused, b_fused = prepare_highway_params(w_affine, b_affine, w_gate, b_gate)

    out = highway_cell(x, w_fused, b_fused)
    out = jax.block_until_ready(out)

    # Pure-JAX f32 reference. Tolerance loosened because the kernel feeds the
    # MXU bf16 inputs (f32 accumulation); the residual x path stays f32.
    g_ref = jnp.maximum(x @ w_affine + b_affine, 0.0)
    t_ref = jax.nn.sigmoid(x @ w_gate + b_gate)
    z_ref = t_ref * g_ref + (1.0 - t_ref) * x
    max_err = float(jnp.max(jnp.abs(out - z_ref)))
    assert jnp.allclose(out, z_ref, atol=3e-2, rtol=3e-2), max_err

    print("KERNEL_OK")
</pallas_src>

<mosaic_0001>
module attributes {stable_mosaic.version = 11 : i64} {
  func.func @highway_kernel(%arg0: i32, %arg1: memref<16x128xf32, #tpu.memory_space<vmem>>, %arg2: memref<128x256xbf16, #tpu.memory_space<vmem>>, %arg3: memref<1x256xf32, #tpu.memory_space<vmem>>, %arg4: memref<16x128xf32, #tpu.memory_space<vmem>>) attributes {dimension_semantics = [#tpu.dimension_semantics<parallel>], iteration_bounds = array<i64: 1>, scalar_prefetch = 0 : i64, scratch_operands = 0 : i64, tpu.core_type = #tpu.core_type<tc>, window_params = [{transform_indices = @transform_0, window_bounds = array<i64: 16, 128>}, {pipeline_mode = #tpu.pipeline_mode<synchronous>, transform_indices = @transform_1, window_bounds = array<i64: 128, 256>}, {pipeline_mode = #tpu.pipeline_mode<synchronous>, transform_indices = @transform_2, window_bounds = array<i64: 1, 256>}, {transform_indices = @transform_3, window_bounds = array<i64: 16, 128>}]} {
    %c0 = arith.constant 0 : index
    %c0_0 = arith.constant 0 : index
    %0 = vector.load %arg1[%c0, %c0_0] : memref<16x128xf32, #tpu.memory_space<vmem>>, vector<16x128xf32>
    %1 = arith.truncf %0 : vector<16x128xf32> to vector<16x128xbf16>
    %c0_1 = arith.constant 0 : index
    %c0_2 = arith.constant 0 : index
    %2 = vector.load %arg2[%c0_1, %c0_2] : memref<128x256xbf16, #tpu.memory_space<vmem>>, vector<128x256xbf16>
    %cst = arith.constant dense<0.000000e+00> : vector<16x256xf32>
    %3 = tpu.matmul %1, %2, %cst {dimension_numbers = #tpu.dot_dimension_numbers<[1], [0], [0], [1], [0, 0, 1, 1], [], []>} : vector<16x128xbf16>, vector<128x256xbf16>, vector<16x256xf32> -> vector<16x256xf32>
    %c0_3 = arith.constant 0 : index
    %c0_4 = arith.constant 0 : index
    %4 = vector.load %arg3[%c0_3, %c0_4] : memref<1x256xf32, #tpu.memory_space<vmem>>, vector<1x256xf32>
    %5 = vector.broadcast %4 : vector<1x256xf32> to vector<16x256xf32>
    %6 = arith.addf %3, %5 : vector<16x256xf32>
    %7 = vector.extract_strided_slice %6 {offsets = [0, 0], sizes = [16, 128], strides = [1, 1]} : vector<16x256xf32> to vector<16x128xf32>
    %cst_5 = arith.constant 0.000000e+00 : f32
    %8 = vector.broadcast %cst_5 : f32 to vector<16x128xf32>
    %9 = arith.maximumf %7, %8 : vector<16x128xf32>
    %10 = vector.extract_strided_slice %6 {offsets = [0, 128], sizes = [16, 128], strides = [1, 1]} : vector<16x256xf32> to vector<16x128xf32>
    %11 = arith.negf %10 : vector<16x128xf32>
    %12 = math.exp %11 : vector<16x128xf32>
    %cst_6 = arith.constant 1.000000e+00 : f32
    %13 = vector.broadcast %cst_6 : f32 to vector<16x128xf32>
    %14 = arith.addf %13, %12 : vector<16x128xf32>
    %15 = arith.divf %13, %14 : vector<16x128xf32>
    %16 = arith.subf %9, %0 : vector<16x128xf32>
    %17 = arith.mulf %15, %16 : vector<16x128xf32>
    %18 = arith.addf %0, %17 : vector<16x128xf32>
    %c0_7 = arith.constant 0 : index
    %c0_8 = arith.constant 0 : index
    %19 = vector.load %arg4[%c0_7, %c0_8] : memref<16x128xf32, #tpu.memory_space<vmem>>, vector<16x128xf32>
    tpu.vector_store %arg4[%c0_7, %c0_8], %18 {strides = array<i32>} : memref<16x128xf32, #tpu.memory_space<vmem>>, vector<16x128xf32>,
    return
  }
  func.func @transform_0(%arg0: i32) -> (i32, i32) {
    %c0_i32 = arith.constant 0 : i32
    %c0_i32_0 = arith.constant 0 : i32
    return %arg0, %c0_i32 : i32, i32
  }
  func.func @transform_1(%arg0: i32) -> (i32, i32) {
    %c0_i32 = arith.constant 0 : i32
    %c0_i32_0 = arith.constant 0 : i32
    %c0_i32_1 = arith.constant 0 : i32
    return %c0_i32, %c0_i32_0 : i32, i32
  }
  func.func @transform_2(%arg0: i32) -> (i32, i32) {
    %c0_i32 = arith.constant 0 : i32
    %c0_i32_0 = arith.constant 0 : i32
    %c0_i32_1 = arith.constant 0 : i32
    return %c0_i32, %c0_i32_0 : i32, i32
  }
  func.func @transform_3(%arg0: i32) -> (i32, i32) {
    %c0_i32 = arith.constant 0 : i32
    %c0_i32_0 = arith.constant 0 : i32
    return %arg0, %c0_i32 : i32, i32
  }
}

</mosaic_0001>

<bundles_post_ra>
// kernel: tpu_custom_call.1
= control target key start
LH: loop header
LB: loop body
LE: loop exit
PB: predicated region body
PF: predicated region fallthrough
CT: control target
= control target key end

     0   :  { %8 = vsyncpa [#allocation3], 0  ;;  %s440_s0 = inlined_call_operand.hbm [shape: f32[8,128], index: 0, kind: input, shape index: {}]   ;;  %s441_s1 = inlined_call_operand.hbm [shape: bf16[128,256], index: 1, kind: input, shape index: {}]   ;;  %s442_s2 = inlined_call_operand.vmem [shape: f32[1,256], index: 2, kind: input, shape index: {}]   ;;  %s443_s3 = inlined_call_operand.hbm [shape: f32[8,128], index: 3, kind: output, shape index: {}]  }
   0x1   :  { %9 = vsyncpa [#allocation6], 0 }
   0x2   :  { %10 = vsyncpa [#allocation4], 0 }
   0x3   :  { %15 = vsyncadd [#allocation3], 128  ;;  %s366_s12 = smov [#allocation2]   ;;  %s294_s16 = scalar_lea.hbm %s440_s0, 128 }
   0x4   :  { %s16_s13 = sshll.u32 %s366_s12, 4  ;;  %p295_p0 = scmp.ne.s32.totalorder %s440_s0, %s294_s16  ;;  %s17_s13 = int_to_ptr.vmem [resolvable:$true] %s16_s13 }
   0x5   :  { %p298_p1 = scmp.lt.u32.totalorder %s294_s16, %s440_s0 }
   0x7   :  { %p300_p2 = pnand %p298_p1, %p295_p0 }
   0x9   :  { %303 = shalt.err (!%p300_p2)
}
   0xa   :  { %s304_s21 = scalar_lea.vmem %s17_s13, 128  ;;  %s308_s22 = scalar_lea.vmem %s17_s13, 256 }
   0xb   :  { %p305_p3 = scmp.ne.s32.totalorder %s17_s13, %s304_s21  ;;  %p309_p4 = scmp.lt.s32.totalorder %s17_s13, %s17_s13 }
   0xc   :  { %p310_p5 = scmp.lt.s32.totalorder %s308_s22, %s304_s21 }
   0xe   :  { %p311_p6 = por %p310_p5, %p309_p4 }
  0x10   :  { %p312_p7 = pnand %p311_p6, %p305_p3 }
  0x12   :  { %315 = shalt.err (!%p312_p7)
}
  0x13   :  { %s367_s23 = smov 128   ;;  %s368_s24 = smov 8  }
  0x14   :  { %22 = dma.hbm_to_vmem [thread:$0]  %s440_s0, 128, %s17_s13, [#allocation3], %s367_s23, %s367_s23, %s368_s24  }
  0x15   :  { %s369_s27 = smov [#allocation5]   ;;  %s316_s4 = scalar_lea.hbm %s441_s1, 2048 }
  0x16   :  { %s28_s28 = sshll.u32 %s369_s27, 4  ;;  %p317_p8 = scmp.ne.s32.totalorder %s441_s1, %s316_s4  ;;  %s29_s28 = int_to_ptr.vmem [resolvable:$true] %s28_s28 }
  0x17   :  { %p320_p9 = scmp.lt.u32.totalorder %s316_s4, %s441_s1 }
  0x19   :  { %p322_p10 = pnand %p320_p9, %p317_p8 }
  0x1b   :  { %325 = shalt.err (!%p322_p10)
}
  0x1c   :  { %s326_s9 = scalar_lea.vmem %s29_s28, 2048  ;;  %p331_p12 = scmp.lt.s32.totalorder %s29_s28, %s29_s28 }
  0x1d   :  { %p327_p11 = scmp.ne.s32.totalorder %s29_s28, %s326_s9  ;;  %p332_p13 = scmp.lt.s32.totalorder %s326_s9, %s326_s9 }
  0x1f   :  { %p333_p0 = por %p332_p13, %p331_p12 }
  0x21   :  { %p334_p1 = pnand %p333_p0, %p327_p11 }
  0x23   :  { %337 = shalt.err (!%p334_p1)
}
  0x24   :  { %34 = dma.hbm_to_vmem [thread:$0]  %s441_s1, 2048, %s29_s28, [#allocation6], %s367_s23, %s367_s23, %s368_s24  }
  0x25   :  { %360 = dma.done.wait [#allocation3], 256  }
  0x26   :  { %361 = vsyncadd [#allocation3], 4294967040 }
  0x27   :  { %362 = dma.done.wait [#allocation6], 2048  }
  0x28   :  { %363 = vsyncadd [#allocation6], 4294965248  ;;  %v370_v0 = vmov 0   ;;  %v262_v1 = vld [vmem:[#allocation5 + $0x4] ss:$8 sps:$4 sm:$0xff]   ;;  %v44_v17 = vld [vmem:[#allocation2] sm:$0xff]  ;;  %v65_v20 = vlaneseq }
  0x29   :  { %187 = vmatprep.mubr.bf16.mxu0 %v370_v0  ;;  %v264_v2 = vld [vmem:[#allocation5] ss:$8 sps:$4 sm:$0xff]   ;;  %155 = vmatprep.subr.bf16.mxu0 %v262_v1  ;;  %v265_v3 = vld [vmem:[#allocation5 + $0x14] ss:$8 sps:$4 sm:$0xff]   ;;  %v267_v4 = vld [vmem:[#allocation5 + $0x10] ss:$8 sps:$4 sm:$0xff]  }
  0x2a   :  { %156 = vmatpush1.bf16.msra.mxu0 %v264_v2  ;;  %v268_v5 = vld [vmem:[#allocation5 + $0x24] ss:$8 sps:$4 sm:$0xff]   ;;  %v270_v6 = vld [vmem:[#allocation5 + $0x20] ss:$8 sps:$4 sm:$0xff]   ;;  %v271_v7 = vld [vmem:[#allocation5 + $0x34] ss:$8 sps:$4 sm:$0xff]  }
  0x2b   :  { %157 = vmatprep.subr.bf16.mxu0 %v265_v3  ;;  %v273_v8 = vld [vmem:[#allocation5 + $0x30] ss:$8 sps:$4 sm:$0xff]   ;;  %v274_v9 = vld [vmem:[#allocation5 + $0x44] ss:$8 sps:$4 sm:$0xff]   ;;  %v276_v10 = vld [vmem:[#allocation5 + $0x40] ss:$8 sps:$4 sm:$0xff]  }
  0x2c   :  { %v277_v11 = vld [vmem:[#allocation5 + $0x54] ss:$8 sps:$4 sm:$0xff]   ;;  %v279_v12 = vld [vmem:[#allocation5 + $0x50] ss:$8 sps:$4 sm:$0xff]   ;;  %v280_v13 = vld [vmem:[#allocation5 + $0x64] ss:$8 sps:$4 sm:$0xff]  }
  0x2d   :  { %v282_v14 = vld [vmem:[#allocation5 + $0x60] ss:$8 sps:$4 sm:$0xff]   ;;  %v283_v15 = vld [vmem:[#allocation5 + $0x74] ss:$8 sps:$4 sm:$0xff]   ;;  %v285_v16 = vld [vmem:[#allocation5 + $0x70] ss:$8 sps:$4 sm:$0xff]  }
  0x2e   :  { %158 = vmatpush1.bf16.msra.mxu0 %v267_v4  ;;  %v45_v18 = vld [vmem:[#allocation2 + $0x8] sm:$0xff]  ;;  %v66_v21 = vshrl.u32 %v65_v20, 7  ;;  %v63_v23 = vld [vmem:[%s442_s2] sm:$0x3] }
  0x2f   :  { %159 = vmatprep.subr.bf16.mxu0 %v268_v5  ;;  %v46_v19 = vpack.c.bf16 %v45_v18, %v44_v17 }
  0x30   :  { %v71_v22 = vsub.s32 1, %v66_v21  ;;  %v67_v33 = vsub.s32 0, %v66_v21 }
  0x32   :  { %160 = vmatpush1.bf16.msra.mxu0 %v270_v6  ;;  %v72_v24 = vrot.slane %v63_v23, %v71_v22  ;;  %v68_v35 = vrot.slane %v63_v23, %v67_v33 }
  0x33   :  { %161 = vmatprep.subr.bf16.mxu0 %v271_v7 }
  0x36   :  { %162 = vmatpush1.bf16.msra.mxu0 %v273_v8 }
  0x37   :  { %163 = vmatprep.subr.bf16.mxu0 %v274_v9 }
  0x3a   :  { %164 = vmatpush1.bf16.msra.mxu0 %v276_v10 }
  0x3b   :  { %165 = vmatprep.subr.bf16.mxu0 %v277_v11 }
  0x3e   :  { %166 = vmatpush1.bf16.msra.mxu0 %v279_v12 }
  0x3f   :  { %167 = vmatprep.subr.bf16.mxu0 %v280_v13 }
  0x42   :  { %168 = vmatpush1.bf16.msra.mxu0 %v282_v14 }
  0x43   :  { %169 = vmatprep.subr.bf16.mxu0 %v283_v15 }
  0x46   :  { %170 = vmatpush1.bf16.msra.mxu0 %v285_v16 }
  0x49   :  { %188 = vmatmul.mubr.bf16.vlgmr.msra.gmra.mrb[0].mxu0 %v46_v19 }
 0x11c   :  { %v189_v25 = vpop.f32.mrb[0].mxu0 }
 0x11d   :  { %v191_v26 = vpop.f32.mrb[1].mxu0  ;;  %v190_v39 = vadd.f32 %v189_v25, %v68_v35 }
 0x11e   :  { %v192_v27 = vadd.f32 %v191_v26, %v72_v24  ;;  %v193_v28 = vpop.f32.mrb[2].mxu0 }
 0x11f   :  { %v195_v29 = vpop.f32.mrb[3].mxu0  ;;  %v194_v40 = vadd.f32 %v193_v28, %v68_v35  ;;  %v198_v41 = vmax.f32 %v190_v39, 0.0 }
 0x120   :  { %v254_v30 = vmul.f32 -1.442695, %v192_v27  ;;  %v196_v31 = vadd.f32 %v195_v29, %v72_v24 }
 0x121   :  { %v199_v42 = vmax.f32 %v194_v40, 0.0  ;;  %v212_v43 = vsub.f32 %v198_v41, %v44_v17 }
 0x122   :  { %286 = vpow2.f32 %v254_v30  ;;  %v255_v32 = vmul.f32 -1.442695, %v196_v31 }
 0x123   :  { %v213_v46 = vsub.f32 %v199_v42, %v45_v18 }
 0x124   :  { %288 = vpow2.f32 %v255_v32 }
 0x12c   :  { %v287_v34 = vpop.eup %286 }
 0x12d   :  { %v206_v36 = vadd.f32 1.0, %v287_v34 }
 0x12e   :  { %v289_v37 = vpop.eup %288 }
 0x12f   :  { %290 = vrcp.f32 %v206_v36  ;;  %v207_v38 = vadd.f32 1.0, %v289_v37 }
 0x131   :  { %292 = vrcp.f32 %v207_v38 }
 0x139   :  { %v291_v44 = vpop.eup %290 }
 0x13a   :  { %v214_v45 = vmul.f32 %v291_v44, %v212_v43 }
 0x13b   :  { %v293_v47 = vpop.eup %292 }
 0x13c   :  { %v216_v48 = vadd.f32 %v214_v45, %v44_v17  ;;  %v215_v49 = vmul.f32 %v293_v47, %v213_v46 }
 0x13e   :  { %218 = vst [vmem:[#allocation7] sm:$0xff] %v216_v48  ;;  %v217_v50 = vadd.f32 %v215_v49, %v45_v18 }
 0x140   :  { %219 = vst [vmem:[#allocation7 + $0x8] sm:$0xff] %v217_v50 }
 0x141   :  { %224 = vsyncadd [#allocation4], 128  ;;  %s371_s2 = smov [#allocation7]  }
 0x142   :  { %s225_s12 = sshll.u32 %s371_s2, 4  ;;  %s226_s12 = int_to_ptr.vmem [resolvable:$true] %s225_s12 }
 0x143   :  { %s338_s13 = scalar_lea.vmem %s226_s12, 128  ;;  %s342_s14 = scalar_lea.vmem %s226_s12, 256 }
 0x144   :  { %p339_p2 = scmp.ne.s32.totalorder %s226_s12, %s338_s13  ;;  %p343_p3 = scmp.lt.s32.totalorder %s226_s12, %s226_s12 }
 0x145   :  { %p344_p4 = scmp.lt.s32.totalorder %s342_s14, %s338_s13 }
 0x147   :  { %p345_p5 = por %p344_p4, %p343_p3 }
 0x149   :  { %p346_p6 = pnand %p345_p5, %p339_p2 }
 0x14b   :  { %349 = shalt.err (!%p346_p6)
}
 0x14c   :  { %s350_s17 = scalar_lea.hbm %s443_s3, 128 }
 0x14d   :  { %p351_p7 = scmp.ne.s32.totalorder %s443_s3, %s350_s17  ;;  %p354_p8 = scmp.lt.u32.totalorder %s350_s17, %s443_s3 }
 0x14f   :  { %p356_p9 = pnand %p354_p8, %p351_p7 }
 0x151   :  { %359 = shalt.err (!%p356_p9)
}
 0x152   :  { %231 = dma.vmem_to_hbm [thread:$0]  %s226_s12, 128, %s443_s3, [#allocation4], %s367_s23, %s367_s23, %s368_s24  }
 0x153   :  { %364 = dma.done.wait [#allocation4], 256  }
 0x154   :  { %365 = vsyncadd [#allocation4], 4294967040 }
 0x155   :  { %235 = vsyncpa [#allocation3], 1 }
 0x156   :  { %236 = vsyncpa [#allocation6], 1 }
 0x157   :  { %237 = vsyncpa [#allocation4], 1 }

</bundles_post_ra>
